<compile_context>
chip_gen: v5e
topology: v5e:2x2
jax: 0.10.0
libtpu: 0.0.40
codegen_flags: <defaults>
</compile_context>

<pallas_src>
import functools

import jax
import jax.numpy as jnp
from jax import lax
from jax.experimental import pallas as pl
from jax.experimental.pallas import tpu as pltpu

_LANE = 128  # TPU lane width; batch tiles are multiples of this.


def _round_up(x, k):
    return ((x + k - 1) // k) * k


def _pick_tile(b_pad):
    """Largest 128-multiple batch tile <= 512 that divides b_pad, preferring a
    grid with >= 2 parallel steps (so v7x's two TensorCores both get work)."""
    for tb in (512, 384, 256, 128):
        if b_pad % tb == 0 and b_pad // tb >= 2:
            return tb
    return b_pad  # small batch: single tile


def _thlista_kernel(a_ref, xr_ref, yr_ref, xi_ref, yi_ref,
                    zr_ref, zi_ref, s_ref, *, n_pad, m_pad, beta):
    # Assemble the stacked RHS slab s = [xr; yr; xi; yi] in VMEM scratch.
    # All row offsets are multiples of 8 -> pure unmasked VMEM stores.
    s_ref[0:n_pad, :] = xr_ref[...]
    s_ref[n_pad:n_pad + m_pad, :] = yr_ref[...]
    s_ref[n_pad + m_pad:2 * n_pad + m_pad, :] = xi_ref[...]
    s_ref[2 * n_pad + m_pad:, :] = yi_ref[...]

    # Single bf16 MXU matmul covering the full complex product W1@x + W2@y,
    # accumulated in f32.
    p = jnp.dot(a_ref[...], s_ref[...].astype(jnp.bfloat16),
                preferred_element_type=jnp.float32)
    pr = p[:n_pad, :]
    pi = p[n_pad:, :]

    # Complex soft-threshold: u * max(|u| - beta, 0) / |u|, rewritten with one
    # rsqrt.  The eps clamp makes |u| = 0 produce scale = 0 (no NaN).
    magsq = pr * pr + pi * pi
    scale = jnp.maximum(1.0 - beta * lax.rsqrt(jnp.maximum(magsq, 1e-30)), 0.0)

    zr_ref[...] = pr * scale
    zi_ref[...] = pi * scale


def build_thlista_weights(v_r, v_i, w2_r, w2_i):
    """Build the stacked real weight A = [[W1r W2r -W1i -W2i],[W1i W2i W1r W2r]].

    Hoisted out of the per-call path: call once per parameter update and reuse
    for every forward pass.  Rows/cols are zero-padded so n, m become multiples
    of 8, and the result is stored in bfloat16 for the MXU.
    Returns A of shape (2*n_pad, 2*(n_pad + m_pad)).
    """
    n, m = w2_r.shape
    n_pad, m_pad = _round_up(n, 8), _round_up(m, 8)

    # v1 = cat(conj(flip(v)), v[1:]);  W1[i, j] = v1[(n-1) + i - j]
    v1_r = jnp.concatenate([v_r[::-1], v_r[1:]])
    v1_i = jnp.concatenate([-v_i[::-1], v_i[1:]])          # conj -> negate imag
    idx = (n - 1) + jnp.arange(n)[:, None] - jnp.arange(n)[None, :]
    w1_r = v1_r[idx]
    w1_i = v1_i[idx]

    def _pad(a, rows, cols):
        return jnp.pad(a, ((0, rows - a.shape[0]), (0, cols - a.shape[1])))

    w1_r = _pad(w1_r, n_pad, n_pad)
    w1_i = _pad(w1_i, n_pad, n_pad)
    w2_r = _pad(w2_r, n_pad, m_pad)
    w2_i = _pad(w2_i, n_pad, m_pad)

    top = jnp.concatenate([w1_r, w2_r, -w1_i, -w2_i], axis=1)
    bot = jnp.concatenate([w1_i, w2_i, w1_r, w2_r], axis=1)
    return jnp.concatenate([top, bot], axis=0).astype(jnp.bfloat16)


@functools.partial(jax.jit, static_argnames=("beta",))
def unit_cell_thlista(a_stacked, x_r, x_i, y_r, y_i, *, beta=0.01):
    """Forward pass of UnitCellThlista.

    a_stacked : (2*n_pad, 2*(n_pad+m_pad)) bf16 weight from build_thlista_weights
    x_*       : (n, B)  input x (real / imag)
    y_*       : (m, B)  input y (real / imag)
    returns z_r, z_i : (n, B)
    """
    n, B = x_r.shape
    m = y_r.shape[0]
    n_pad, m_pad = _round_up(n, 8), _round_up(m, 8)
    k = 2 * (n_pad + m_pad)
    assert a_stacked.shape == (2 * n_pad, k), "weight/input shape mismatch"

    # Zero-pad row dims to multiples of 8 (no-op when already aligned).
    if n_pad != n:
        x_r = jnp.pad(x_r, ((0, n_pad - n), (0, 0)))
        x_i = jnp.pad(x_i, ((0, n_pad - n), (0, 0)))
    if m_pad != m:
        y_r = jnp.pad(y_r, ((0, m_pad - m), (0, 0)))
        y_i = jnp.pad(y_i, ((0, m_pad - m), (0, 0)))

    # Pad the batch (lane) axis to a multiple of 128 -> lane-dense output,
    # unmasked vector stores, full MXU N width.
    b_pad = _round_up(B, _LANE)
    tb = _pick_tile(b_pad)
    if b_pad != B:
        pad = ((0, 0), (0, b_pad - B))
        x_r, x_i = jnp.pad(x_r, pad), jnp.pad(x_i, pad)
        y_r, y_i = jnp.pad(y_r, pad), jnp.pad(y_i, pad)

    grid = (b_pad // tb,)
    kernel = functools.partial(_thlista_kernel, n_pad=n_pad, m_pad=m_pad,
                               beta=float(beta))

    w_spec = pl.BlockSpec((2 * n_pad, k), lambda j: (0, 0))   # weights resident
    x_spec = pl.BlockSpec((n_pad, tb), lambda j: (0, j))
    y_spec = pl.BlockSpec((m_pad, tb), lambda j: (0, j))
    o_spec = pl.BlockSpec((n_pad, tb), lambda j: (0, j))

    z_r, z_i = pl.pallas_call(
        kernel,
        out_shape=(jax.ShapeDtypeStruct((n_pad, b_pad), jnp.float32),
                   jax.ShapeDtypeStruct((n_pad, b_pad), jnp.float32)),
        grid=grid,
        in_specs=[w_spec, x_spec, y_spec, x_spec, y_spec],
        out_specs=(o_spec, o_spec),
        scratch_shapes=[pltpu.VMEM((k, tb), jnp.float32)],    # RHS slab
        compiler_params=pltpu.CompilerParams(
            dimension_semantics=("parallel",)),                # shards v7x's 2 TCs
    )(a_stacked, x_r, y_r, x_i, y_i)

    if n_pad != n or b_pad != B:
        return z_r[:n, :B], z_i[:n, :B]
    return z_r, z_i


def _reference(v_r, v_i, w2_r, w2_i, x_r, x_i, y_r, y_i, beta=0.01):
    """Plain-JAX reference (complex64) for a correctness sanity check."""
    v = v_r + 1j * v_i
    w2 = w2_r + 1j * w2_i
    x = x_r + 1j * x_i
    y = y_r + 1j * y_i
    n = v.shape[0]
    v1 = jnp.concatenate([jnp.conj(v[::-1]), v[1:]])
    idx = (n - 1) + jnp.arange(n)[:, None] - jnp.arange(n)[None, :]
    w1 = v1[idx]
    p = w1 @ x + w2 @ y
    mag = jnp.abs(p)
    z = p * jnp.maximum(mag - beta, 0.0) / jnp.maximum(mag, 1e-30)
    return jnp.real(z), jnp.imag(z)


if __name__ == "__main__":
    # Small deterministic shapes: n = 32 (sparse code dim), m = 16 (measurement
    # dim).  Two batch sizes: B = 8 (single tile) and B = 260 (multi-tile grid).
    n, m = 32, 16
    beta = 0.01

    key = jax.random.PRNGKey(0)
    ks = jax.random.split(key, 8)
    # Parameters (deterministic init; module __init__ takes v and A = W2^H).
    v_r = 0.1 * jax.random.normal(ks[0], (n,), jnp.float32)
    v_i = 0.1 * jax.random.normal(ks[1], (n,), jnp.float32)
    w2_r = 0.1 * jax.random.normal(ks[2], (n, m), jnp.float32)
    w2_i = 0.1 * jax.random.normal(ks[3], (n, m), jnp.float32)

    # Build stacked weights once (per parameter update), reuse for every call.
    a_stacked = build_thlista_weights(v_r, v_i, w2_r, w2_i)

    ok = True
    for B in (8, 260):
        kb = jax.random.fold_in(key, B)
        kb = jax.random.split(kb, 4)
        x_r = jax.random.normal(kb[0], (n, B), jnp.float32)
        x_i = jax.random.normal(kb[1], (n, B), jnp.float32)
        y_r = jax.random.normal(kb[2], (m, B), jnp.float32)
        y_i = jax.random.normal(kb[3], (m, B), jnp.float32)

        z_r, z_i = unit_cell_thlista(a_stacked, x_r, x_i, y_r, y_i, beta=beta)
        jax.block_until_ready((z_r, z_i))

        ref_r, ref_i = _reference(v_r, v_i, w2_r, w2_i, x_r, x_i, y_r, y_i, beta)
        # Tolerance loosened vs. the f32 version because the matmul runs on the
        # bf16 MXU path (epilogue stays f32).
        ok &= bool(jnp.allclose(z_r, ref_r, atol=3e-2, rtol=3e-2))
        ok &= bool(jnp.allclose(z_i, ref_i, atol=3e-2, rtol=3e-2))

    assert ok, "mismatch vs. reference"
    print("KERNEL_OK")
</pallas_src>

<mosaic_0001>
module attributes {stable_mosaic.version = 11 : i64} {
  func.func @_thlista_kernel(%arg0: i32, %arg1: memref<64x96xbf16, #tpu.memory_space<vmem>>, %arg2: memref<32x128xf32, #tpu.memory_space<vmem>>, %arg3: memref<16x128xf32, #tpu.memory_space<vmem>>, %arg4: memref<32x128xf32, #tpu.memory_space<vmem>>, %arg5: memref<16x128xf32, #tpu.memory_space<vmem>>, %arg6: memref<32x128xf32, #tpu.memory_space<vmem>>, %arg7: memref<32x128xf32, #tpu.memory_space<vmem>>, %arg8: memref<96x128xf32, #tpu.memory_space<vmem>>) attributes {dimension_semantics = [#tpu.dimension_semantics<parallel>], iteration_bounds = array<i64: 1>, scalar_prefetch = 0 : i64, scratch_operands = 1 : i64, tpu.core_type = #tpu.core_type<tc>, window_params = [{pipeline_mode = #tpu.pipeline_mode<synchronous>, transform_indices = @transform_0, window_bounds = array<i64: 64, 96>}, {transform_indices = @transform_1, window_bounds = array<i64: 32, 128>}, {transform_indices = @transform_2, window_bounds = array<i64: 16, 128>}, {transform_indices = @transform_3, window_bounds = array<i64: 32, 128>}, {transform_indices = @transform_4, window_bounds = array<i64: 16, 128>}, {transform_indices = @transform_5, window_bounds = array<i64: 32, 128>}, {transform_indices = @transform_6, window_bounds = array<i64: 32, 128>}]} {
    %c0 = arith.constant 0 : index
    %c0_0 = arith.constant 0 : index
    %0 = vector.load %arg2[%c0, %c0_0] : memref<32x128xf32, #tpu.memory_space<vmem>>, vector<32x128xf32>
    %c0_1 = arith.constant 0 : index
    %c0_2 = arith.constant 0 : index
    %1 = vector.load %arg8[%c0_1, %c0_2] : memref<96x128xf32, #tpu.memory_space<vmem>>, vector<32x128xf32>
    tpu.vector_store %arg8[%c0_1, %c0_2], %0 {strides = array<i32>} : memref<96x128xf32, #tpu.memory_space<vmem>>, vector<32x128xf32>,
    %c0_3 = arith.constant 0 : index
    %c0_4 = arith.constant 0 : index
    %2 = vector.load %arg3[%c0_3, %c0_4] : memref<16x128xf32, #tpu.memory_space<vmem>>, vector<16x128xf32>
    %c32 = arith.constant 32 : index
    %c0_5 = arith.constant 0 : index
    %3 = vector.load %arg8[%c32, %c0_5] : memref<96x128xf32, #tpu.memory_space<vmem>>, vector<16x128xf32>
    tpu.vector_store %arg8[%c32, %c0_5], %2 {strides = array<i32>} : memref<96x128xf32, #tpu.memory_space<vmem>>, vector<16x128xf32>,
    %c0_6 = arith.constant 0 : index
    %c0_7 = arith.constant 0 : index
    %4 = vector.load %arg4[%c0_6, %c0_7] : memref<32x128xf32, #tpu.memory_space<vmem>>, vector<32x128xf32>
    %c48 = arith.constant 48 : index
    %c0_8 = arith.constant 0 : index
    %5 = vector.load %arg8[%c48, %c0_8] : memref<96x128xf32, #tpu.memory_space<vmem>>, vector<32x128xf32>
    tpu.vector_store %arg8[%c48, %c0_8], %4 {strides = array<i32>} : memref<96x128xf32, #tpu.memory_space<vmem>>, vector<32x128xf32>,
    %c0_9 = arith.constant 0 : index
    %c0_10 = arith.constant 0 : index
    %6 = vector.load %arg5[%c0_9, %c0_10] : memref<16x128xf32, #tpu.memory_space<vmem>>, vector<16x128xf32>
    %c80 = arith.constant 80 : index
    %c0_11 = arith.constant 0 : index
    %7 = vector.load %arg8[%c80, %c0_11] : memref<96x128xf32, #tpu.memory_space<vmem>>, vector<16x128xf32>
    tpu.vector_store %arg8[%c80, %c0_11], %6 {strides = array<i32>} : memref<96x128xf32, #tpu.memory_space<vmem>>, vector<16x128xf32>,
    %c0_12 = arith.constant 0 : index
    %c0_13 = arith.constant 0 : index
    %8 = vector.load %arg1[%c0_12, %c0_13] : memref<64x96xbf16, #tpu.memory_space<vmem>>, vector<64x96xbf16>
    %c0_14 = arith.constant 0 : index
    %c0_15 = arith.constant 0 : index
    %9 = vector.load %arg8[%c0_14, %c0_15] : memref<96x128xf32, #tpu.memory_space<vmem>>, vector<96x128xf32>
    %10 = arith.truncf %9 : vector<96x128xf32> to vector<96x128xbf16>
    %cst = arith.constant dense<0.000000e+00> : vector<64x128xf32>
    %11 = tpu.matmul %8, %10, %cst {dimension_numbers = #tpu.dot_dimension_numbers<[1], [0], [0], [1], [0, 0, 1, 1], [], []>} : vector<64x96xbf16>, vector<96x128xbf16>, vector<64x128xf32> -> vector<64x128xf32>
    %12 = vector.extract_strided_slice %11 {offsets = [0, 0], sizes = [32, 128], strides = [1, 1]} : vector<64x128xf32> to vector<32x128xf32>
    %13 = vector.extract_strided_slice %11 {offsets = [32, 0], sizes = [32, 128], strides = [1, 1]} : vector<64x128xf32> to vector<32x128xf32>
    %14 = arith.mulf %12, %12 : vector<32x128xf32>
    %15 = arith.mulf %13, %13 : vector<32x128xf32>
    %16 = arith.addf %14, %15 : vector<32x128xf32>
    %cst_16 = arith.constant 1.000000e-30 : f32
    %17 = vector.broadcast %cst_16 : f32 to vector<32x128xf32>
    %18 = arith.maximumf %16, %17 : vector<32x128xf32>
    %19 = math.rsqrt %18 : vector<32x128xf32>
    %cst_17 = arith.constant 0.00999999977 : f32
    %20 = vector.broadcast %cst_17 : f32 to vector<32x128xf32>
    %21 = arith.mulf %20, %19 : vector<32x128xf32>
    %cst_18 = arith.constant 1.000000e+00 : f32
    %22 = vector.broadcast %cst_18 : f32 to vector<32x128xf32>
    %23 = arith.subf %22, %21 : vector<32x128xf32>
    %cst_19 = arith.constant 0.000000e+00 : f32
    %24 = vector.broadcast %cst_19 : f32 to vector<32x128xf32>
    %25 = arith.maximumf %23, %24 : vector<32x128xf32>
    %26 = arith.mulf %12, %25 : vector<32x128xf32>
    %c0_20 = arith.constant 0 : index
    %c0_21 = arith.constant 0 : index
    %27 = vector.load %arg6[%c0_20, %c0_21] : memref<32x128xf32, #tpu.memory_space<vmem>>, vector<32x128xf32>
    tpu.vector_store %arg6[%c0_20, %c0_21], %26 {strides = array<i32>} : memref<32x128xf32, #tpu.memory_space<vmem>>, vector<32x128xf32>,
    %28 = arith.mulf %13, %25 : vector<32x128xf32>
    %c0_22 = arith.constant 0 : index
    %c0_23 = arith.constant 0 : index
    %29 = vector.load %arg7[%c0_22, %c0_23] : memref<32x128xf32, #tpu.memory_space<vmem>>, vector<32x128xf32>
    tpu.vector_store %arg7[%c0_22, %c0_23], %28 {strides = array<i32>} : memref<32x128xf32, #tpu.memory_space<vmem>>, vector<32x128xf32>,
    return
  }
  func.func @transform_0(%arg0: i32) -> (i32, i32) {
    %c0_i32 = arith.constant 0 : i32
    %c0_i32_0 = arith.constant 0 : i32
    %c0_i32_1 = arith.constant 0 : i32
    return %c0_i32, %c0_i32_0 : i32, i32
  }
  func.func @transform_1(%arg0: i32) -> (i32, i32) {
    %c0_i32 = arith.constant 0 : i32
    %c0_i32_0 = arith.constant 0 : i32
    return %c0_i32, %arg0 : i32, i32
  }
  func.func @transform_2(%arg0: i32) -> (i32, i32) {
    %c0_i32 = arith.constant 0 : i32
    %c0_i32_0 = arith.constant 0 : i32
    return %c0_i32, %arg0 : i32, i32
  }
  func.func @transform_3(%arg0: i32) -> (i32, i32) {
    %c0_i32 = arith.constant 0 : i32
    %c0_i32_0 = arith.constant 0 : i32
    return %c0_i32, %arg0 : i32, i32
  }
  func.func @transform_4(%arg0: i32) -> (i32, i32) {
    %c0_i32 = arith.constant 0 : i32
    %c0_i32_0 = arith.constant 0 : i32
    return %c0_i32, %arg0 : i32, i32
  }
  func.func @transform_5(%arg0: i32) -> (i32, i32) {
    %c0_i32 = arith.constant 0 : i32
    %c0_i32_0 = arith.constant 0 : i32
    return %c0_i32, %arg0 : i32, i32
  }
  func.func @transform_6(%arg0: i32) -> (i32, i32) {
    %c0_i32 = arith.constant 0 : i32
    %c0_i32_0 = arith.constant 0 : i32
    return %c0_i32, %arg0 : i32, i32
  }
}

</mosaic_0001>

<bundles_post_ra>
// kernel: unit_cell_thlista.1
= control target key start
LH: loop header
LB: loop body
LE: loop exit
PB: predicated region body
PF: predicated region fallthrough
CT: control target
= control target key end

     0   :  { %vm93_vm0 = vcmask 785408   ;;  %s424_s4 = inlined_call_operand.vmem [shape: f32[16,128], index: 4, kind: input, shape index: {}]   ;;  %s425_s3 = inlined_call_operand.vmem [shape: f32[32,128], index: 3, kind: input, shape index: {}]   ;;  %s426_s2 = inlined_call_operand.vmem [shape: f32[16,128], index: 2, kind: input, shape index: {}]   ;;  %s427_s1 = inlined_call_operand.vmem [shape: f32[32,128], index: 1, kind: input, shape index: {}]   ;;  %s428_s0 = inlined_call_operand.vmem [shape: bf16[64,96], index: 0, kind: input, shape index: {}]   ;;  %s429_s5 = inlined_call_operand.vmem [shape: f32[32,128], index: 5, kind: output, shape index: {0}]   ;;  %s430_s6 = inlined_call_operand.vmem [shape: f32[32,128], index: 6, kind: output, shape index: {1}]  }
   0x1   :  { %v43_v0 = vld [vmem:[%s424_s4] sm:$0xff]  ;;  %v44_v1 = vld [vmem:[%s424_s4 + $0x8] sm:$0xff]  ;;  %v37_v2 = vld [vmem:[%s425_s3 + $0x10] sm:$0xff] }
   0x2   :  { %v72_v3 = vpack.c.bf16 %v44_v1, %v43_v0  ;;  %v38_v4 = vld [vmem:[%s425_s3 + $0x18] sm:$0xff]  ;;  %v35_v6 = vld [vmem:[%s425_s3] sm:$0xff]  ;;  %v36_v7 = vld [vmem:[%s425_s3 + $0x8] sm:$0xff] }
   0x3   :  { %v71_v5 = vpack.c.bf16 %v38_v4, %v37_v2  ;;  %v70_v8 = vpack.c.bf16 %v36_v7, %v35_v6  ;;  %v31_v9 = vld [vmem:[%s426_s2] sm:$0xff]  ;;  %v32_v10 = vld [vmem:[%s426_s2 + $0x8] sm:$0xff]  ;;  %v25_v12 = vld [vmem:[%s427_s1 + $0x10] sm:$0xff] }
   0x4   :  { %108 = vmatpush.bf16.msra.mxu0 %v72_v3  ;;  %251 = vmatpush.bf16.msra.mxu1 %v72_v3  ;;  %v69_v11 = vpack.c.bf16 %v32_v10, %v31_v9  ;;  %v26_v13 = vld [vmem:[%s427_s1 + $0x18] sm:$0xff]  ;;  %v23_v15 = vld [vmem:[%s427_s1] sm:$0xff]  ;;  %v24_v16 = vld [vmem:[%s427_s1 + $0x8] sm:$0xff] }
   0x5   :  { %252 = vmatpush.bf16.msra.mxu2 %v72_v3  ;;  %253 = vmatpush.bf16.msra.mxu3 %v72_v3  ;;  %v68_v14 = vpack.c.bf16 %v26_v13, %v25_v12  ;;  %v67_v17 = vpack.c.bf16 %v24_v16, %v23_v15  ;;  %v247_v18 = vld [vmem:[%s428_s0] sm:$0xff]  ;;  %v248_v19 = vld [vmem:[%s428_s0 + $0x8] sm:$0xff]  ;;  %v249_v20 = vld [vmem:[%s428_s0 + $0x10] sm:$0xff] }
   0x6   :  { %v250_v21 = vld [vmem:[%s428_s0 + $0x18] sm:$0xff] }
   0x8   :  { %109 = vmatpush.bf16.msra.mxu0 %v71_v5  ;;  %254 = vmatpush.bf16.msra.mxu1 %v71_v5 }
   0x9   :  { %255 = vmatpush.bf16.msra.mxu2 %v71_v5  ;;  %256 = vmatpush.bf16.msra.mxu3 %v71_v5 }
   0xc   :  { %110 = vmatpush.bf16.msra.mxu0 %v70_v8  ;;  %257 = vmatpush.bf16.msra.mxu1 %v70_v8 }
   0xd   :  { %258 = vmatpush.bf16.msra.mxu2 %v70_v8  ;;  %259 = vmatpush.bf16.msra.mxu3 %v70_v8 }
  0x10   :  { %111 = vmatpush.bf16.msra.mxu0 %v69_v11  ;;  %260 = vmatpush.bf16.msra.mxu1 %v69_v11 }
  0x11   :  { %261 = vmatpush.bf16.msra.mxu2 %v69_v11  ;;  %262 = vmatpush.bf16.msra.mxu3 %v69_v11 }
  0x14   :  { %112 = vmatpush.bf16.msra.mxu0 %v68_v14  ;;  %263 = vmatpush.bf16.msra.mxu1 %v68_v14 }
  0x15   :  { %264 = vmatpush.bf16.msra.mxu2 %v68_v14  ;;  %265 = vmatpush.bf16.msra.mxu3 %v68_v14 }
  0x18   :  { %113 = vmatpush.bf16.msra.mxu0 %v67_v17  ;;  %266 = vmatpush.bf16.msra.mxu1 %v67_v17 }
  0x19   :  { %267 = vmatpush.bf16.msra.mxu2 %v67_v17  ;;  %268 = vmatpush.bf16.msra.mxu3 %v67_v17 }
  0x1b   :  { %243 = vmatmul.msk.bf16.vlgmr.msra.gmra.mxu0 %vm93_vm0, %v247_v18  ;;  %244 = vmatmul.msk.bf16.vlgmr.msra.gmra.mxu1 %vm93_vm0, %v248_v19 }
  0x1c   :  { %245 = vmatmul.msk.bf16.vlgmr.msra.gmra.mxu2 %vm93_vm0, %v249_v20  ;;  %246 = vmatmul.msk.bf16.vlgmr.msra.gmra.mxu3 %vm93_vm0, %v250_v21 }
  0x98   :  { %v360_v22 = vpop.f32.mrf.mxu0  ;;  %v362_v23 = vpop.f32.mrf.mxu1 }
  0x99   :  { %v135_v24 = vmul.f32 %v360_v22, %v360_v22  ;;  %v137_v25 = vmul.f32 %v362_v23, %v362_v23 }
  0x9f   :  { %v368_v26 = vpop.f32.mrf.mxu2  ;;  %v370_v27 = vpop.f32.mrf.mxu3 }
  0xa0   :  { %v139_v28 = vmul.f32 %v368_v26, %v368_v26  ;;  %v141_v29 = vmul.f32 %v370_v27, %v370_v27  ;;  %v376_v34 = vpop.f32.mrf.mxu0  ;;  %v378_v35 = vpop.f32.mrf.mxu1 }
  0xa1   :  { %v136_v38 = vmul.f32 %v376_v34, %v376_v34  ;;  %v138_v39 = vmul.f32 %v378_v35, %v378_v35 }
  0xa2   :  { %v143_v30 = vadd.f32 %v139_v28, %v135_v24  ;;  %v145_v31 = vadd.f32 %v141_v29, %v137_v25 }
  0xa4   :  { %v147_v32 = vmax.f32 %v143_v30, 1e-30  ;;  %v149_v33 = vmax.f32 %v145_v31, 1e-30 }
  0xa6   :  { %269 = vrsqrt.f32 %v147_v32  ;;  %vm157_vm3 = vweird.f32 %v147_v32  ;;  %vm177_vm5 = vweird.f32 %v149_v33 }
  0xa7   :  { %271 = vrsqrt.f32 %v149_v33  ;;  %v380_v36 = vpop.f32.mrf.mxu2  ;;  %v382_v37 = vpop.f32.mrf.mxu3 }
  0xa8   :  { %v140_v40 = vmul.f32 %v380_v36, %v380_v36  ;;  %v142_v41 = vmul.f32 %v382_v37, %v382_v37 }
  0xaa   :  { %v144_v42 = vadd.f32 %v140_v40, %v136_v38  ;;  %v146_v43 = vadd.f32 %v142_v41, %v138_v39 }
  0xac   :  { %v270_v44 = vpop.eup %269  ;;  %v148_v45 = vmax.f32 %v144_v42, 1e-30  ;;  %v150_v46 = vmax.f32 %v146_v43, 1e-30 }
  0xad   :  { %v272_v47 = vpop.eup %271  ;;  %v152_v48 = vmul.f32 %v270_v44, %v147_v32  ;;  %vm158_vm1 = vweird.f32 %v270_v44 }
  0xae   :  { %v172_v49 = vmul.f32 %v272_v47, %v149_v33  ;;  %273 = vrsqrt.f32 %v148_v45  ;;  %vm178_vm2 = vweird.f32 %v272_v47  ;;  %vm159_vm4 = vmor %vm157_vm3, %vm158_vm1  ;;  %vm167_vm9 = vweird.f32 %v148_v45 }
  0xaf   :  { %v153_v50 = vmul.f32 %v270_v44, %v152_v48  ;;  %275 = vrsqrt.f32 %v150_v46  ;;  %vm179_vm6 = vmor %vm177_vm5, %vm178_vm2  ;;  %vm187_vm11 = vweird.f32 %v150_v46 }
  0xb0   :  { %v173_v51 = vmul.f32 %v272_v47, %v172_v49 }
  0xb1   :  { %v154_v52 = vmul.f32 0.5, %v153_v50 }
  0xb2   :  { %v174_v53 = vmul.f32 0.5, %v173_v51 }
  0xb3   :  { %v155_v54 = vsub.f32 1.5, %v154_v52 }
  0xb4   :  { %v274_v55 = vpop.eup %273  ;;  %v175_v56 = vsub.f32 1.5, %v174_v53 }
  0xb5   :  { %v276_v57 = vpop.eup %275  ;;  %v156_v58 = vmul.f32 %v270_v44, %v155_v54  ;;  %v162_v59 = vmul.f32 %v274_v55, %v148_v45  ;;  %vm168_vm7 = vweird.f32 %v274_v55 }
  0xb6   :  { %v176_v60 = vmul.f32 %v272_v47, %v175_v56  ;;  %v182_v61 = vmul.f32 %v276_v57, %v150_v46  ;;  %vm188_vm8 = vweird.f32 %v276_v57  ;;  %vm169_vm10 = vmor %vm167_vm9, %vm168_vm7 }
  0xb7   :  { %v160_v62 = vsel %vm159_vm4, %v270_v44, %v156_v58  ;;  %v163_v63 = vmul.f32 %v274_v55, %v162_v59  ;;  %vm189_vm12 = vmor %vm187_vm11, %vm188_vm8 }
  0xb8   :  { %v191_v0 = vmul.f32 0.01, %v160_v62  ;;  %v180_v1 = vsel %vm179_vm6, %v272_v47, %v176_v60  ;;  %v183_v2 = vmul.f32 %v276_v57, %v182_v61 }
  0xb9   :  { %v193_v3 = vmul.f32 0.01, %v180_v1  ;;  %v164_v4 = vmul.f32 0.5, %v163_v63 }
  0xba   :  { %v195_v5 = vsub.f32 1.0, %v191_v0  ;;  %v184_v6 = vmul.f32 0.5, %v183_v2 }
  0xbb   :  { %v197_v7 = vsub.f32 1.0, %v193_v3  ;;  %v165_v8 = vsub.f32 1.5, %v164_v4 }
  0xbc   :  { %v199_v9 = vmax.f32 %v195_v5, 0.0  ;;  %v185_v10 = vsub.f32 1.5, %v184_v6 }
  0xbd   :  { %v201_v11 = vmax.f32 %v197_v7, 0.0  ;;  %v166_v12 = vmul.f32 %v274_v55, %v165_v8 }
  0xbe   :  { %v203_v13 = vmul.f32 %v199_v9, %v360_v22  ;;  %v211_v14 = vmul.f32 %v199_v9, %v368_v26  ;;  %v186_v15 = vmul.f32 %v276_v57, %v185_v10 }
  0xbf   :  { %v205_v16 = vmul.f32 %v201_v11, %v362_v23  ;;  %v213_v17 = vmul.f32 %v201_v11, %v370_v27  ;;  %v170_v18 = vsel %vm169_vm10, %v274_v55, %v166_v12 }
  0xc0   :  { %207 = vst [vmem:[%s429_s5] sm:$0xff] %v203_v13  ;;  %v192_v19 = vmul.f32 0.01, %v170_v18  ;;  %v190_v20 = vsel %vm189_vm12, %v276_v57, %v186_v15 }
  0xc1   :  { %215 = vst [vmem:[%s430_s6] sm:$0xff] %v211_v14  ;;  %v194_v21 = vmul.f32 0.01, %v190_v20 }
  0xc2   :  { %209 = vst [vmem:[%s429_s5 + $0x10] sm:$0xff] %v205_v16  ;;  %v196_v22 = vsub.f32 1.0, %v192_v19 }
  0xc3   :  { %217 = vst [vmem:[%s430_s6 + $0x10] sm:$0xff] %v213_v17  ;;  %v198_v23 = vsub.f32 1.0, %v194_v21 }
  0xc4   :  { %v200_v24 = vmax.f32 %v196_v22, 0.0 }
  0xc5   :  { %v202_v25 = vmax.f32 %v198_v23, 0.0 }
  0xc6   :  { %v204_v26 = vmul.f32 %v200_v24, %v376_v34  ;;  %v212_v27 = vmul.f32 %v200_v24, %v380_v36 }
  0xc7   :  { %v206_v28 = vmul.f32 %v202_v25, %v378_v35  ;;  %v214_v29 = vmul.f32 %v202_v25, %v382_v37 }
  0xc8   :  { %208 = vst [vmem:[%s429_s5 + $0x8] sm:$0xff] %v204_v26 }
  0xc9   :  { %216 = vst [vmem:[%s430_s6 + $0x8] sm:$0xff] %v212_v27 }
  0xca   :  { %210 = vst [vmem:[%s429_s5 + $0x18] sm:$0xff] %v206_v28 }
  0xcb   :  { %218 = vst [vmem:[%s430_s6 + $0x18] sm:$0xff] %v214_v29 }

</bundles_post_ra>
